<compile_context>
chip_gen: v5e
topology: v5e:2x2
jax: 0.10.0
libtpu: 0.0.40
codegen_flags: <defaults>
</compile_context>

<pallas_src>
import jax
import jax.numpy as jnp
from jax.experimental import pallas as pl
from jax.experimental.pallas import tpu as pltpu


def flowstep_kernel(x_ref, w_ref, nb_ref, o_ref):
    # x_ref:  (NB, C, T)  NB images' channels x a lane-dense tile of H*W pixels
    # w_ref:  (C, C)      actnorm-folded invconv weight: exp(-logs)[:, None] * W
    # nb_ref: (C, 1)      -bias (added after the channel mix)
    # o_ref:  (NB, C, T)
    x = x_ref[...]                                   # (NB, C, T)
    w = w_ref[...]                                   # (C, C)
    nb = nb_ref[...]                                 # (C, 1)
    C = x.shape[1]
    if C <= 8:
        # Tiny channel count: an MXU tile would be >98% padding, so do the
        # channel mix as C unrolled broadcast-FMAs on the VPU.  (For C >= 16
        # the VPU path becomes VALU-bound on v5e/v6e -> use the MXU instead.)
        acc = nb[None] + w[None, :, 0:1] * x[:, 0:1, :]
        for k in range(1, C):
            acc = acc + w[None, :, k:k + 1] * x[:, k:k + 1, :]
    else:
        acc = jnp.einsum("ck,bkt->bct", x.dtype.type(1) * w, x,
                         preferred_element_type=jnp.float32)
        acc = acc + nb[None]
    o_ref[...] = acc.astype(o_ref.dtype)


def flowstep_forward(z_nchw, invconv_weight, actnorm_logs, actnorm_bias):
    """FlowStep.forward (noCoupling / invconv / actnorm-reverse), NCHW in/out."""
    N, C, H, W = z_nchw.shape
    HW = H * W
    dtype = z_nchw.dtype
    elt = jnp.dtype(dtype).itemsize
    x = z_nchw.reshape(N, C, HW)                     # zero-copy view, no transpose

    # Fold actnorm's per-channel scale into the 1x1-conv weight (one-time
    # O(C^2) param transform; mirrors FlowStep.fuse_actnorm).  Params are cast
    # to the activation dtype so bf16 activations get a bf16 x bf16 MXU dot
    # (accumulation stays f32 via preferred_element_type).
    w_scaled = (invconv_weight * jnp.exp(-actnorm_logs)[:, None]).astype(dtype)
    neg_bias = (-actnorm_bias).reshape(C, 1).astype(dtype)

    # ---- VMEM-budget-driven tiling ------------------------------------------
    # Sublane-padded channel count: a (C, T) slab occupies ceil(C/8)*8 sublanes
    # for f32 (ceil(C/16)*16 for bf16, /32 for 8-bit) in VMEM.
    sub = max(1, 4 // elt) * 8                       # 8 (f32), 16 (bf16), 32 (int8)
    c_pad = ((C + sub - 1) // sub) * sub

    # Generation-aware scoped-VMEM ceiling: ~96 MiB on v5e/v6e (128 MiB phys),
    # ~48 MiB on v7x (64 MiB phys per TC).
    try:
        vmem_cap = int(pltpu.get_tpu_info().vmem_capacity_bytes)
    except Exception:                                # conservative fallback
        vmem_cap = 64 << 20
    vmem_ceiling = (vmem_cap * 3) // 4

    # Resident params (lane/sublane padded) + fixed headroom.
    lane_pad_c = max(128, ((C + 127) // 128) * 128)
    overhead = 2 * c_pad * lane_pad_c * elt + (2 << 20)

    # Target per stream buffer (2 double-buffered inputs + 2 outputs): 4-12 MiB,
    # clamped so all four buffers + overhead stay under the ceiling.
    per_buf_cap = max(1 << 20, (vmem_ceiling - overhead) // 4)
    target_buf_bytes = min(12 << 20, per_buf_cap)

    bytes_per_pixel = c_pad * elt                    # padded VMEM bytes per H*W pixel
    max_pixels = max(128, target_buf_bytes // bytes_per_pixel)

    if HW <= max_pixels:
        tile_hw = HW                                 # whole image per step (full-dim block)
        nb = max(1, min(N, max_pixels // max(HW, 1)))  # widen over the batch axis
    else:
        tile_hw = max(128, (min(max_pixels, HW) // 128) * 128)  # lane-dense multiple of 128
        nb = 1

    tile_hw_pad = ((tile_hw + 127) // 128) * 128
    buf_bytes = nb * c_pad * tile_hw_pad * elt
    vmem_limit = int(min(max(4 * buf_bytes + overhead, 4 << 20), vmem_ceiling))

    grid = (pl.cdiv(N, nb), pl.cdiv(HW, tile_hw))    # partial blocks: padded reads, masked writes

    cost = pl.CostEstimate(
        flops=2 * N * C * C * HW,
        transcendentals=0,
        bytes_accessed=2 * N * C * HW * elt + (C * C + C) * elt,
    )

    out = pl.pallas_call(
        flowstep_kernel,
        out_shape=jax.ShapeDtypeStruct((N, C, HW), dtype),
        grid_spec=pltpu.PrefetchScalarGridSpec(
            num_scalar_prefetch=0,
            grid=grid,
            in_specs=[
                pl.BlockSpec((nb, C, tile_hw), lambda b, j: (b, 0, j)),  # pixel/batch tile
                pl.BlockSpec((C, C), lambda b, j: (0, 0)),               # folded weight
                pl.BlockSpec((C, 1), lambda b, j: (0, 0)),               # -bias
            ],
            out_specs=pl.BlockSpec((nb, C, tile_hw), lambda b, j: (b, 0, j)),
        ),
        compiler_params=pltpu.CompilerParams(
            # Both axes independent; lets v7x shard grid steps over its 2 TCs.
            dimension_semantics=("parallel", "parallel"),
            vmem_limit_bytes=vmem_limit,
        ),
        cost_estimate=cost,
    )(x, w_scaled, neg_bias)

    return out.reshape(N, C, H, W)                   # zero-copy view back to NCHW


def init_params(key, in_channels):
    """Deterministic parameter init mirroring the module's __init__ shapes."""
    (k_w,) = jax.random.split(key, 1)
    # InvertibleConv1x1: orthogonal (QR of gaussian), shape (C, C)
    w_init = jnp.linalg.qr(jax.random.normal(k_w, (in_channels, in_channels),
                                             dtype=jnp.float32))[0]
    # ActNorm2d params (shape (1, C, 1, 1) in torch; stored flat here).
    # TODO(synk): srflow's ActNorm does a data-dependent init on first call;
    # we use fixed deterministic values instead (synthetic kernel).
    logs = jnp.linspace(-0.1, 0.1, in_channels, dtype=jnp.float32)
    bias = jnp.linspace(-0.05, 0.05, in_channels, dtype=jnp.float32)
    return w_init, logs, bias


def flowstep_reference(z_nchw, weight, logs, bias):
    """Plain-JAX reference of the same forward (for correctness check)."""
    # 1x1 conv over NCHW: y[n,c,h,w] = sum_k W[c,k] x[n,k,h,w]
    y = jnp.einsum("ck,nkhw->nchw", weight, z_nchw)
    # actnorm reverse: scale then center, per channel
    y = y * jnp.exp(-logs)[None, :, None, None] - bias[None, :, None, None]
    return y


if __name__ == "__main__":
    key = jax.random.PRNGKey(0)
    k_x, k_p = jax.random.split(key)

    N, C, H, W = 2, 4, 16, 16        # NCHW, matches the module's conv convention
    z = jax.random.normal(k_x, (N, C, H, W), dtype=jnp.float32)
    weight, logs, bias = init_params(k_p, C)

    out = flowstep_forward(z, weight, logs, bias)
    out = jax.block_until_ready(out)

    ref = flowstep_reference(z, weight, logs, bias)
    assert out.shape == (N, C, H, W)
    assert jnp.allclose(out, ref, atol=1e-5, rtol=1e-5), "mismatch vs reference"

    print("KERNEL_OK")
</pallas_src>

<mosaic_0001>
module attributes {stable_mosaic.version = 11 : i64} {
  func.func @flowstep_kernel(%arg0: i32, %arg1: i32, %arg2: memref<2x4x256xf32, #tpu.memory_space<vmem>>, %arg3: memref<4x4xf32, #tpu.memory_space<vmem>>, %arg4: memref<4x1xf32, #tpu.memory_space<vmem>>, %arg5: memref<2x4x256xf32, #tpu.memory_space<vmem>>) attributes {dimension_semantics = [#tpu.dimension_semantics<parallel>, #tpu.dimension_semantics<parallel>], iteration_bounds = array<i64: 1, 1>, scalar_prefetch = 0 : i64, scratch_operands = 0 : i64, tpu.core_type = #tpu.core_type<tc>, window_params = [{transform_indices = @transform_0, window_bounds = array<i64: 2, 4, 256>}, {pipeline_mode = #tpu.pipeline_mode<synchronous>, transform_indices = @transform_1, window_bounds = array<i64: 4, 4>}, {pipeline_mode = #tpu.pipeline_mode<synchronous>, transform_indices = @transform_2, window_bounds = array<i64: 4, 1>}, {transform_indices = @transform_3, window_bounds = array<i64: 2, 4, 256>}]} {
    %c0 = arith.constant 0 : index
    %c0_0 = arith.constant 0 : index
    %c0_1 = arith.constant 0 : index
    %0 = vector.load %arg2[%c0, %c0_0, %c0_1] : memref<2x4x256xf32, #tpu.memory_space<vmem>>, vector<2x4x256xf32>
    %c0_2 = arith.constant 0 : index
    %c0_3 = arith.constant 0 : index
    %1 = vector.load %arg3[%c0_2, %c0_3] : memref<4x4xf32, #tpu.memory_space<vmem>>, vector<4x4xf32>
    %c0_4 = arith.constant 0 : index
    %c0_5 = arith.constant 0 : index
    %2 = vector.load %arg4[%c0_4, %c0_5] : memref<4x1xf32, #tpu.memory_space<vmem>>, vector<4x1xf32>
    %3 = vector.shape_cast %2 : vector<4x1xf32> to vector<1x4x1xf32>
    %4 = vector.extract_strided_slice %1 {offsets = [0, 0], sizes = [4, 1], strides = [1, 1]} : vector<4x4xf32> to vector<4x1xf32>
    %5 = vector.shape_cast %4 : vector<4x1xf32> to vector<1x4x1xf32>
    %6 = vector.extract_strided_slice %0 {offsets = [0, 0, 0], sizes = [2, 1, 256], strides = [1, 1, 1]} : vector<2x4x256xf32> to vector<2x1x256xf32>
    %7 = vector.broadcast %5 : vector<1x4x1xf32> to vector<2x4x256xf32>
    %8 = vector.broadcast %6 : vector<2x1x256xf32> to vector<2x4x256xf32>
    %9 = arith.mulf %7, %8 : vector<2x4x256xf32>
    %10 = vector.broadcast %3 : vector<1x4x1xf32> to vector<2x4x256xf32>
    %11 = arith.addf %10, %9 : vector<2x4x256xf32>
    %12 = vector.extract_strided_slice %1 {offsets = [0, 1], sizes = [4, 1], strides = [1, 1]} : vector<4x4xf32> to vector<4x1xf32>
    %13 = vector.shape_cast %12 : vector<4x1xf32> to vector<1x4x1xf32>
    %14 = vector.extract_strided_slice %0 {offsets = [0, 1, 0], sizes = [2, 1, 256], strides = [1, 1, 1]} : vector<2x4x256xf32> to vector<2x1x256xf32>
    %15 = vector.broadcast %13 : vector<1x4x1xf32> to vector<2x4x256xf32>
    %16 = vector.broadcast %14 : vector<2x1x256xf32> to vector<2x4x256xf32>
    %17 = arith.mulf %15, %16 : vector<2x4x256xf32>
    %18 = arith.addf %11, %17 : vector<2x4x256xf32>
    %19 = vector.extract_strided_slice %1 {offsets = [0, 2], sizes = [4, 1], strides = [1, 1]} : vector<4x4xf32> to vector<4x1xf32>
    %20 = vector.shape_cast %19 : vector<4x1xf32> to vector<1x4x1xf32>
    %21 = vector.extract_strided_slice %0 {offsets = [0, 2, 0], sizes = [2, 1, 256], strides = [1, 1, 1]} : vector<2x4x256xf32> to vector<2x1x256xf32>
    %22 = vector.broadcast %20 : vector<1x4x1xf32> to vector<2x4x256xf32>
    %23 = vector.broadcast %21 : vector<2x1x256xf32> to vector<2x4x256xf32>
    %24 = arith.mulf %22, %23 : vector<2x4x256xf32>
    %25 = arith.addf %18, %24 : vector<2x4x256xf32>
    %26 = vector.extract_strided_slice %1 {offsets = [0, 3], sizes = [4, 1], strides = [1, 1]} : vector<4x4xf32> to vector<4x1xf32>
    %27 = vector.shape_cast %26 : vector<4x1xf32> to vector<1x4x1xf32>
    %28 = vector.extract_strided_slice %0 {offsets = [0, 3, 0], sizes = [2, 1, 256], strides = [1, 1, 1]} : vector<2x4x256xf32> to vector<2x1x256xf32>
    %29 = vector.broadcast %27 : vector<1x4x1xf32> to vector<2x4x256xf32>
    %30 = vector.broadcast %28 : vector<2x1x256xf32> to vector<2x4x256xf32>
    %31 = arith.mulf %29, %30 : vector<2x4x256xf32>
    %32 = arith.addf %25, %31 : vector<2x4x256xf32>
    %c0_6 = arith.constant 0 : index
    %c0_7 = arith.constant 0 : index
    %c0_8 = arith.constant 0 : index
    %33 = vector.load %arg5[%c0_6, %c0_7, %c0_8] : memref<2x4x256xf32, #tpu.memory_space<vmem>>, vector<2x4x256xf32>
    tpu.vector_store %arg5[%c0_6, %c0_7, %c0_8], %32 {strides = array<i32>} : memref<2x4x256xf32, #tpu.memory_space<vmem>>, vector<2x4x256xf32>,
    return
  }
  func.func @transform_0(%arg0: i32, %arg1: i32) -> (i32, i32, i32) {
    %c0_i32 = arith.constant 0 : i32
    %c0_i32_0 = arith.constant 0 : i32
    return %arg0, %c0_i32, %arg1 : i32, i32, i32
  }
  func.func @transform_1(%arg0: i32, %arg1: i32) -> (i32, i32) {
    %c0_i32 = arith.constant 0 : i32
    %c0_i32_0 = arith.constant 0 : i32
    %c0_i32_1 = arith.constant 0 : i32
    return %c0_i32, %c0_i32_0 : i32, i32
  }
  func.func @transform_2(%arg0: i32, %arg1: i32) -> (i32, i32) {
    %c0_i32 = arith.constant 0 : i32
    %c0_i32_0 = arith.constant 0 : i32
    %c0_i32_1 = arith.constant 0 : i32
    return %c0_i32, %c0_i32_0 : i32, i32
  }
  func.func @transform_3(%arg0: i32, %arg1: i32) -> (i32, i32, i32) {
    %c0_i32 = arith.constant 0 : i32
    %c0_i32_0 = arith.constant 0 : i32
    return %arg0, %c0_i32, %arg1 : i32, i32, i32
  }
}

</mosaic_0001>

<bundles_post_ra>
// kernel: tpu_custom_call.1
= control target key start
LH: loop header
LB: loop body
LE: loop exit
PB: predicated region body
PF: predicated region fallthrough
CT: control target
= control target key end

     0   :  { %8 = vsyncpa [#allocation3], 0  ;;  %s282_s0 = inlined_call_operand.hbm [shape: f32[2,4,256], index: 0, kind: input, shape index: {}]   ;;  %s283_s1 = inlined_call_operand.vmem [shape: f32[4,4], index: 1, kind: input, shape index: {}]   ;;  %s284_s2 = inlined_call_operand.vmem [shape: f32[4,1], index: 2, kind: input, shape index: {}]   ;;  %s285_s3 = inlined_call_operand.hbm [shape: f32[2,4,256], index: 3, kind: output, shape index: {}]  }
   0x1   :  { %9 = vsyncpa [#allocation4], 0  ;;  %s14_s14 = sshll.u32 %s282_s0, 4  ;;  %s236_s15 = smov [#allocation2]   ;;  %s15_s14 = int_to_ptr.hbm [resolvable:$true] %s14_s14 }
   0x2   :  { %s16_s16 = sshll.u32 %s236_s15, 4  ;;  %s237_s17 = smov 128   ;;  %s17_s16 = int_to_ptr.vmem [resolvable:$true] %s16_s16 }
   0x3   :  { %s238_s18 = smov 8  }
   0x4   :  { %22 = dma.hbm_to_vmem [thread:$0]  %s15_s14, 256, %s17_s16, [#allocation3], %s237_s17, %s237_s17, %s238_s18  }
   0x5   :  { %232 = dma.done.wait [#allocation3], 256  }
   0x6   :  { %233 = vsyncadd [#allocation3], 4294967040  ;;  %v239_v0 = vmov 0   ;;  %v240_v1 = vmov 1   ;;  %v241_v2 = vmov 3   ;;  %v242_v5 = vmov 2  }
   0x7   :  { %179 = vset.pattern.permute.xlu0 %v239_v0  ;;  %180 = vset.pattern.permute.xlu1 %v240_v1  ;;  %v33_v3 = vld [vmem:[%s283_s1] sm:$0xf]  ;;  %v32_v7 = vld [vmem:[#allocation2 + $0x8] sm:$0xff]  ;;  %vm145_vm0 = vcmask 1043456   ;;  %s243_s1 = smov [#allocation5]   ;;  %s158_s24 = sshll.u32 %s285_s3, 4  ;;  %s159_s24 = int_to_ptr.hbm [resolvable:$true] %s158_s24 }
   0x8   :  { %182 = vset.pattern.permute.xlu2 %v241_v2  ;;  %37 = vperm.xlu0 %179, %v33_v3   ;;  %v34_v4 = vld [vmem:[%s284_s2] sm:$0xf]  ;;  %v122_v9 = vperm.slane %v32_v7, 7  ;;  %v44_v12 = vperm.slane %v32_v7, 0  ;;  %v45_v13 = vperm.slane %v32_v7, 4  ;;  %v73_v18 = vperm.slane %v32_v7, 1 }
   0x9   :  { %68 = vperm.xlu1 %180, %v33_v3   ;;  %116 = vperm.xlu2 %182, %v33_v3   ;;  %v31_v6 = vld [vmem:[#allocation2] sm:$0xff]  ;;  %v74_v19 = vperm.slane %v32_v7, 5  ;;  %v97_v22 = vperm.slane %v32_v7, 2  ;;  %v98_v23 = vperm.slane %v32_v7, 6  ;;  %v121_v25 = vperm.slane %v32_v7, 3  ;;  %s156_s2 = sshll.u32 %s243_s1, 4  ;;  %s157_s2 = int_to_ptr.vmem [resolvable:$true] %s156_s2 }
   0xa   :  { %v120_v8 = vperm.slane %v31_v6, 7  ;;  %v42_v10 = vperm.slane %v31_v6, 0  ;;  %v43_v11 = vperm.slane %v31_v6, 4  ;;  %v71_v16 = vperm.slane %v31_v6, 1 }
   0xb   :  { %v72_v17 = vperm.slane %v31_v6, 5  ;;  %v95_v20 = vperm.slane %v31_v6, 2  ;;  %v96_v21 = vperm.slane %v31_v6, 6  ;;  %v119_v24 = vperm.slane %v31_v6, 3 }
   0xc   :  { %v128_v26 = vperm.slane %v120_v8, 3  ;;  %v130_v27 = vperm.slane %v122_v9, 3  ;;  %v50_v28 = vperm.slane %v42_v10, 0  ;;  %v51_v29 = vperm.slane %v43_v11, 0 }
   0xd   :  { %v52_v30 = vperm.slane %v44_v12, 0  ;;  %v53_v31 = vperm.slane %v45_v13, 0  ;;  %v79_v33 = vperm.slane %v71_v16, 1  ;;  %v80_v34 = vperm.slane %v72_v17, 1 }
   0xe   :  { %v81_v35 = vperm.slane %v73_v18, 1  ;;  %v82_v36 = vperm.slane %v74_v19, 1  ;;  %v103_v37 = vperm.slane %v95_v20, 2  ;;  %v104_v38 = vperm.slane %v96_v21, 2 }
   0xf   :  { %v105_v39 = vperm.slane %v97_v22, 2  ;;  %v106_v40 = vperm.slane %v98_v23, 2  ;;  %v127_v41 = vperm.slane %v119_v24, 3  ;;  %v129_v42 = vperm.slane %v121_v25, 3 }
  0x10   :  { %60 = vperm.xlu0 %179, %v34_v4  }
  0x11   :  { %181 = vset.pattern.permute.xlu1 %v242_v5 }
  0x12   :  { %92 = vperm.xlu1 %181, %v33_v3  }
  0x18   :  { %183 = vset.pattern.permute.xlu0 %v241_v2 }
  0x63   :  { %v117_v32 = vpop.permute.xlu2 %116 }
  0x64   :  { %v132_v43 = vmul.f32 %v128_v26, %v117_v32  ;;  %v134_v44 = vmul.f32 %v130_v27, %v117_v32  ;;  %v131_v3 = vmul.f32 %v127_v41, %v117_v32  ;;  %v133_v4 = vmul.f32 %v129_v42, %v117_v32 }
  0x7a   :  { %v38_v14 = vpop.permute.xlu0 %37 }
  0x7b   :  { %v69_v15 = vpop.permute.xlu1 %68  ;;  %v54_v45 = vmul.f32 %v50_v28, %v38_v14  ;;  %v55_v46 = vmul.f32 %v51_v29, %v38_v14  ;;  %v56_v47 = vmul.f32 %v52_v30, %v38_v14  ;;  %v57_v48 = vmul.f32 %v53_v31, %v38_v14 }
  0x7c   :  { %v83_v49 = vmul.f32 %v79_v33, %v69_v15  ;;  %v84_v50 = vmul.f32 %v80_v34, %v69_v15  ;;  %v85_v51 = vmul.f32 %v81_v35, %v69_v15  ;;  %v86_v52 = vmul.f32 %v82_v36, %v69_v15 }
  0x82   :  { %v61_v53 = vpop.permute.xlu0 %60 }
  0x83   :  { %v63_v54 = vadd.f32 %v61_v53, %v54_v45  ;;  %v64_v55 = vadd.f32 %v61_v53, %v55_v46  ;;  %v65_v56 = vadd.f32 %v61_v53, %v56_v47  ;;  %v66_v57 = vadd.f32 %v61_v53, %v57_v48 }
  0x84   :  { %v93_v58 = vpop.permute.xlu1 %92 }
  0x85   :  { %v107_v59 = vmul.f32 %v103_v37, %v93_v58  ;;  %v108_v60 = vmul.f32 %v104_v38, %v93_v58  ;;  %v109_v61 = vmul.f32 %v105_v39, %v93_v58  ;;  %v110_v62 = vmul.f32 %v106_v40, %v93_v58 }
  0x86   :  { %v87_v63 = vadd.f32 %v83_v49, %v63_v54  ;;  %v88_v0 = vadd.f32 %v84_v50, %v64_v55  ;;  %v89_v1 = vadd.f32 %v85_v51, %v65_v56  ;;  %v90_v2 = vadd.f32 %v86_v52, %v66_v57 }
  0x88   :  { %v111_v5 = vadd.f32 %v107_v59, %v87_v63  ;;  %v112_v6 = vadd.f32 %v108_v60, %v88_v0  ;;  %v113_v7 = vadd.f32 %v109_v61, %v89_v1  ;;  %v114_v8 = vadd.f32 %v110_v62, %v90_v2 }
  0x8a   :  { %v136_v9 = vadd.f32 %v132_v43, %v112_v6  ;;  %v138_v10 = vadd.f32 %v134_v44, %v114_v8  ;;  %v135_v11 = vadd.f32 %v131_v3, %v111_v5  ;;  %v137_v12 = vadd.f32 %v133_v4, %v113_v7 }
  0x8c   :  { %v143_v13 = vrot.slane %v136_v9, 4  ;;  %v144_v14 = vrot.slane %v138_v10, 4 }
  0x8e   :  { %v146_v15 = vsel %vm145_vm0, %v135_v11, %v143_v13  ;;  %v147_v16 = vsel %vm145_vm0, %v137_v12, %v144_v14 }
  0x8f   :  { %150 = vst [vmem:[#allocation5] sm:$0xff] %v146_v15 }
  0x90   :  { %151 = vst [vmem:[#allocation5 + $0x8] sm:$0xff] %v147_v16 }
  0x91   :  { %164 = dma.vmem_to_hbm [thread:$0]  %s157_s2, 256, %s159_s24, [#allocation4], %s237_s17, %s237_s17, %s238_s18  }
  0x92   :  { %234 = dma.done.wait [#allocation4], 256  }
  0x93   :  { %235 = vsyncadd [#allocation4], 4294967040 }
  0x94   :  { %169 = vsyncpa [#allocation3], 1 }
  0x95   :  { %170 = vsyncpa [#allocation4], 1 }

</bundles_post_ra>
